<compile_context>
chip_gen: v6e
topology: v6e:2x2x1
jax: 0.10.0
libtpu: 0.0.40
codegen_flags: <defaults>
</compile_context>

<pallas_src>
import math

import jax
import jax.numpy as jnp
from jax.experimental import pallas as pl
from jax.experimental.pallas import tpu as pltpu


def _linear_sub_kernel(x_ref, w_ref, x2_ref, o_ref):
    # x_ref : (TMp, pack*K)        packed activation tile
    # w_ref : (pack*K, pack*N)     block-diagonal weight (pack copies of W^T), resident
    # x2_ref: (TMp, pack*N)        packed, D2-periodic subtrahend tile, resident
    # o_ref : (TMp, pack*N)
    y = jnp.dot(x_ref[...], w_ref[...], preferred_element_type=jnp.float32)
    o_ref[...] = (y - x2_ref[...]).astype(o_ref.dtype)


def model_forward(x1, x2, weight, *, tm_max=16384):
    B, D1, D2, K = x1.shape
    N = weight.shape[0]
    M = B * D1 * D2
    out_dtype = jnp.promote_types(jnp.promote_types(x1.dtype, weight.dtype), x2.dtype)

    # Pack `pack` original rows into one lane-dense row: pack*N == 128 output lanes.
    assert 128 % N == 0, "row packing assumes Cout divides the 128-lane width"
    pack = 128 // N  # 32 for this module (Cout=4) -> 96 input lanes, 128 output lanes

    # Sublane alignment of the packed tiles (8 rows for 4-byte dtypes, 16 for 2-byte).
    min_itemsize = min(jnp.dtype(x1.dtype).itemsize, jnp.dtype(out_dtype).itemsize)
    sublane = {4: 8, 2: 16, 1: 32}.get(int(min_itemsize), 8)

    # tm (in ORIGINAL rows) must be a multiple of:
    #   * pack * sublane -> packed tile has an aligned sublane count
    #   * D2             -> the D2-periodic x2 pattern is identical in every tile
    row_align = math.lcm(pack * sublane, D2)

    tm = min(tm_max, M)
    if M > 8 * row_align:
        # keep the grid >= ~8 tiles so both TensorCores (v7x) stay busy
        tm = min(tm, pl.cdiv(M, 8))
    tm = max(row_align, (tm // row_align) * row_align)
    num_tiles = pl.cdiv(M, tm)
    m_pad = num_tiles * tm

    # ---- packing: pure row-major reshapes, zero extra HBM traffic ----
    x_flat = x1.reshape(M, K)
    if m_pad != M:
        x_flat = jnp.pad(x_flat, ((0, m_pad - M), (0, 0)))
    x_packed = x_flat.reshape(m_pad // pack, pack * K)              # (Mp, 96)

    # Block-diagonal weight: lane group r maps its K input lanes to its N output lanes.
    w_packed = jnp.kron(jnp.eye(pack, dtype=weight.dtype), weight.T)  # (96, 128)

    # One tile's worth of the (D2, N) subtrahend, packed the same way.
    x2_rows = jnp.tile(x2.reshape(D2, N), (tm // D2, 1))            # (tm, N)
    x2_packed = x2_rows.reshape(tm // pack, pack * N)               # (TMp, 128)

    tmp = tm // pack
    mp = m_pad // pack

    cost = pl.CostEstimate(
        flops=2 * M * K * N,
        transcendentals=0,
        bytes_accessed=(M * K * jnp.dtype(x1.dtype).itemsize
                        + M * N * jnp.dtype(out_dtype).itemsize
                        + weight.size * jnp.dtype(weight.dtype).itemsize
                        + x2.size * jnp.dtype(x2.dtype).itemsize),
    )

    out = pl.pallas_call(
        _linear_sub_kernel,
        out_shape=jax.ShapeDtypeStruct((mp, pack * N), out_dtype),
        grid=(num_tiles,),
        in_specs=[
            pl.BlockSpec((tmp, pack * K), lambda i: (i, 0)),        # activations: tiled over M
            pl.BlockSpec((pack * K, pack * N), lambda i: (0, 0)),   # weight: VMEM-resident
            pl.BlockSpec((tmp, pack * N), lambda i: (0, 0)),        # x2 tile: VMEM-resident
        ],
        out_specs=pl.BlockSpec((tmp, pack * N), lambda i: (i, 0)),
        compiler_params=pltpu.CompilerParams(
            dimension_semantics=("parallel",),   # shard M tiles across TensorCores
            vmem_limit_bytes=32 * 1024 * 1024,
        ),
        cost_estimate=cost,
    )(x_packed, w_packed, x2_packed)

    out = out.reshape(m_pad, N)                  # bit-identical un-packing reshape
    if m_pad != M:
        out = out[:M]                            # drop zero-padded tail rows
    return out.reshape(B, D1, D2, N)


if __name__ == "__main__":
    key = jax.random.PRNGKey(0)
    k1, k2, k3 = jax.random.split(key, 3)

    # Shapes implied by the module: Linear(3 -> 4, bias=False), channels-last x1,
    # x2 broadcast-compatible with the linear output.
    B, D1, D2, CIN, COUT = 1, 4, 4, 3, 4
    x1 = jax.random.normal(k1, (B, D1, D2, CIN), dtype=jnp.float32)
    x2 = jax.random.normal(k2, (1, D2, COUT), dtype=jnp.float32)
    weight = jax.random.normal(k3, (COUT, CIN), dtype=jnp.float32) * 0.1

    out = model_forward(x1, x2, weight)
    out = jax.block_until_ready(out)

    # Plain-JAX reference (same semantics as the torch module).
    ref = jnp.einsum("bijc,oc->bijo", x1, weight) - x2[jnp.newaxis]
    assert out.shape == (B, D1, D2, COUT)
    assert jnp.allclose(out, ref, atol=1e-5, rtol=1e-5)

    print("KERNEL_OK")
</pallas_src>

<mosaic_0001>
module attributes {stable_mosaic.version = 11 : i64} {
  func.func @_linear_sub_kernel(%arg0: i32, %arg1: memref<8x96xf32, #tpu.memory_space<vmem>>, %arg2: memref<96x128xf32, #tpu.memory_space<vmem>>, %arg3: memref<8x128xf32, #tpu.memory_space<vmem>>, %arg4: memref<8x128xf32, #tpu.memory_space<vmem>>) attributes {dimension_semantics = [#tpu.dimension_semantics<parallel>], iteration_bounds = array<i64: 1>, scalar_prefetch = 0 : i64, scratch_operands = 0 : i64, tpu.core_type = #tpu.core_type<tc>, window_params = [{transform_indices = @transform_0, window_bounds = array<i64: 8, 96>}, {pipeline_mode = #tpu.pipeline_mode<synchronous>, transform_indices = @transform_1, window_bounds = array<i64: 96, 128>}, {pipeline_mode = #tpu.pipeline_mode<synchronous>, transform_indices = @transform_2, window_bounds = array<i64: 8, 128>}, {transform_indices = @transform_3, window_bounds = array<i64: 8, 128>}]} {
    %c0 = arith.constant 0 : index
    %c0_0 = arith.constant 0 : index
    %0 = vector.load %arg1[%c0, %c0_0] : memref<8x96xf32, #tpu.memory_space<vmem>>, vector<8x96xf32>
    %c0_1 = arith.constant 0 : index
    %c0_2 = arith.constant 0 : index
    %1 = vector.load %arg2[%c0_1, %c0_2] : memref<96x128xf32, #tpu.memory_space<vmem>>, vector<96x128xf32>
    %cst = arith.constant dense<0.000000e+00> : vector<8x128xf32>
    %2 = tpu.matmul %0, %1, %cst {dimension_numbers = #tpu.dot_dimension_numbers<[1], [0], [0], [1], [0, 0, 1, 1], [], []>} : vector<8x96xf32>, vector<96x128xf32>, vector<8x128xf32> -> vector<8x128xf32>
    %c0_3 = arith.constant 0 : index
    %c0_4 = arith.constant 0 : index
    %3 = vector.load %arg3[%c0_3, %c0_4] : memref<8x128xf32, #tpu.memory_space<vmem>>, vector<8x128xf32>
    %4 = arith.subf %2, %3 : vector<8x128xf32>
    %c0_5 = arith.constant 0 : index
    %c0_6 = arith.constant 0 : index
    %5 = vector.load %arg4[%c0_5, %c0_6] : memref<8x128xf32, #tpu.memory_space<vmem>>, vector<8x128xf32>
    tpu.vector_store %arg4[%c0_5, %c0_6], %4 {strides = array<i32>} : memref<8x128xf32, #tpu.memory_space<vmem>>, vector<8x128xf32>,
    return
  }
  func.func @transform_0(%arg0: i32) -> (i32, i32) {
    %c0_i32 = arith.constant 0 : i32
    %c0_i32_0 = arith.constant 0 : i32
    return %arg0, %c0_i32 : i32, i32
  }
  func.func @transform_1(%arg0: i32) -> (i32, i32) {
    %c0_i32 = arith.constant 0 : i32
    %c0_i32_0 = arith.constant 0 : i32
    %c0_i32_1 = arith.constant 0 : i32
    return %c0_i32, %c0_i32_0 : i32, i32
  }
  func.func @transform_2(%arg0: i32) -> (i32, i32) {
    %c0_i32 = arith.constant 0 : i32
    %c0_i32_0 = arith.constant 0 : i32
    %c0_i32_1 = arith.constant 0 : i32
    return %c0_i32, %c0_i32_0 : i32, i32
  }
  func.func @transform_3(%arg0: i32) -> (i32, i32) {
    %c0_i32 = arith.constant 0 : i32
    %c0_i32_0 = arith.constant 0 : i32
    return %arg0, %c0_i32 : i32, i32
  }
}

</mosaic_0001>

<bundles_post_ra>
// kernel: tpu_custom_call.1
= control target key start
LH: loop header
LB: loop body
LE: loop exit
PB: predicated region body
PF: predicated region fallthrough
CT: control target
= control target key end

     0   :  { %8 = vsyncpa [#allocation3], 0  ;;  %s333_s0 = inlined_call_operand.hbm [shape: f32[8,96], index: 0, kind: input, shape index: {}]   ;;  %s334_s1 = inlined_call_operand.hbm [shape: f32[96,128], index: 1, kind: input, shape index: {}]   ;;  %s335_s2 = inlined_call_operand.hbm [shape: f32[8,128], index: 2, kind: input, shape index: {}]   ;;  %s336_s3 = inlined_call_operand.hbm [shape: f32[8,128], index: 3, kind: output, shape index: {}]  }
   0x1   :  { %9 = vsyncpa [#allocation6], 0 }
   0x2   :  { %10 = vsyncpa [#allocation4], 0  ;;  %s293_s12 = smov [#allocation5]  }
   0x3   :  { %s26_s13 = sshll.u32 %s293_s12, 4  ;;  %s27_s13 = int_to_ptr.vmem [resolvable:$true] %s26_s13 }
   0x4   :  { %s215_s14 = scalar_lea.vmem %s27_s13, 1536  ;;  %p220_p1 = scmp.lt.s32.totalorder %s27_s13, %s27_s13 }
   0x5   :  { %p216_p0 = scmp.ne.s32.totalorder %s27_s13, %s215_s14  ;;  %p221_p2 = scmp.lt.s32.totalorder %s215_s14, %s215_s14 }
   0x7   :  { %p222_p3 = por %p221_p2, %p220_p1 }
   0x9   :  { %p223_p4 = pnand %p222_p3, %p216_p0 }
   0xb   :  { %226 = shalt.err (!%p223_p4)
}
   0xc   :  { %s294_s15 = smov 128   ;;  %s295_s16 = smov 8  }
   0xd   :  { %32 = dma.hbm_to_vmem [thread:$0]  %s334_s1, 1536, %s27_s13, [#allocation6], %s294_s15, %s294_s15, %s295_s16  }
   0xe   :  { %s296_s19 = smov [#allocation2]   ;;  %s297_s21 = smov [#allocation7]  }
   0xf   :  { %s17_s20 = sshll.u32 %s296_s19, 4  ;;  %s39_s22 = sshll.u32 %s297_s21, 4  ;;  %s18_s20 = int_to_ptr.vmem [resolvable:$true] %s17_s20  ;;  %s40_s22 = int_to_ptr.vmem [resolvable:$true] %s39_s22 }
  0x10   :  { %s235_s23 = scalar_lea.vmem %s18_s20, 128  ;;  %p240_p6 = scmp.lt.s32.totalorder %s18_s20, %s18_s20 }
  0x11   :  { %p236_p5 = scmp.ne.s32.totalorder %s18_s20, %s235_s23  ;;  %p241_p7 = scmp.lt.s32.totalorder %s235_s23, %s235_s23 }
  0x13   :  { %p242_p8 = por %p241_p7, %p240_p6 }
  0x15   :  { %p243_p9 = pnand %p242_p8, %p236_p5 }
  0x17   :  { %246 = shalt.err (!%p243_p9)
}
  0x18   :  { %20 = dma.hbm_to_vmem [thread:$0]  %s333_s0, 128, %s18_s20, [#allocation3]  }
  0x19   :  { %s255_s26 = scalar_lea.vmem %s40_s22, 128  ;;  %p260_p11 = scmp.lt.s32.totalorder %s40_s22, %s40_s22 }
  0x1a   :  { %p256_p10 = scmp.ne.s32.totalorder %s40_s22, %s255_s26  ;;  %p261_p12 = scmp.lt.s32.totalorder %s255_s26, %s255_s26 }
  0x1c   :  { %p262_p13 = por %p261_p12, %p260_p11 }
  0x1e   :  { %p263_p0 = pnand %p262_p13, %p256_p10 }
  0x20   :  { %266 = shalt.err (!%p263_p0)
}
  0x21   :  { %42 = dma.hbm_to_vmem [thread:$0]  %s335_s2, 128, %s40_s22, [#allocation6]  }
  0x22   :  { %287 = dma.done.wait [#allocation3], 128  }
  0x23   :  { %288 = vsyncadd [#allocation3], 4294967168 }
  0x24   :  { %289 = dma.done.wait [#allocation6], 1664  }
  0x25   :  { %290 = vsyncadd [#allocation6], 4294965632  ;;  %v298_v0 = vmov 0.0   ;;  %vm299_vm0 = vmmov 0   ;;  %v64_v1 = vld [vmem:[#allocation5 + $0x58] sm:$0xff]  ;;  %v63_v2 = vld [vmem:[#allocation5 + $0x50] sm:$0xff] }
  0x26   :  { %172 = vmatprep.subr.mxu0 %v298_v0  ;;  %196 = vmatprep.mubr.msk.f32.mxu0 %vm299_vm0, %v298_v0  ;;  %v62_v3 = vld [vmem:[#allocation5 + $0x48] sm:$0xff]  ;;  %v61_v4 = vld [vmem:[#allocation5 + $0x40] sm:$0xff]  ;;  %v60_v5 = vld [vmem:[#allocation5 + $0x38] sm:$0xff]  ;;  %vm65_vm1 = vcmask 785408   ;;  %s300_s0 = smov [#allocation8]  }
  0x27   :  { %173 = vmatpush3.msra.mxu0 %v64_v1  ;;  %v59_v6 = vld [vmem:[#allocation5 + $0x30] sm:$0xff]  ;;  %v58_v7 = vld [vmem:[#allocation5 + $0x28] sm:$0xff]  ;;  %v57_v8 = vld [vmem:[#allocation5 + $0x20] sm:$0xff]  ;;  %s148_s2 = sshll.u32 %s300_s0, 4  ;;  %s149_s2 = int_to_ptr.vmem [resolvable:$true] %s148_s2 }
  0x28   :  { %174 = vmatprep.subr.mxu0 %v298_v0  ;;  %v56_v9 = vld [vmem:[#allocation5 + $0x18] sm:$0xff]  ;;  %v55_v10 = vld [vmem:[#allocation5 + $0x10] sm:$0xff]  ;;  %v54_v11 = vld [vmem:[#allocation5 + $0x8] sm:$0xff]  ;;  %s267_s28 = scalar_lea.vmem %s149_s2, 128  ;;  %p272_p2 = scmp.lt.s32.totalorder %s149_s2, %s149_s2 }
  0x29   :  { %175 = vmatpush3.msra.mxu0 %v63_v2  ;;  %v53_v12 = vld [vmem:[#allocation5] sm:$0xff]  ;;  %v52_v13 = vld [vmem:[#allocation2] sm:$0xff]  ;;  %p268_p1 = scmp.ne.s32.totalorder %s149_s2, %s267_s28  ;;  %p273_p3 = scmp.lt.s32.totalorder %s267_s28, %s267_s28 }
  0x2a   :  { %176 = vmatprep.subr.mxu0 %v298_v0  ;;  %v139_v14 = vld [vmem:[#allocation7] sm:$0xff] }
  0x2b   :  { %177 = vmatpush3.msra.mxu0 %v62_v3  ;;  %p274_p4 = por %p273_p3, %p272_p2 }
  0x2c   :  { %178 = vmatprep.subr.mxu0 %v298_v0 }
  0x2d   :  { %179 = vmatpush3.msra.mxu0 %v61_v4  ;;  %p275_p5 = pnand %p274_p4, %p268_p1 }
  0x2e   :  { %180 = vmatprep.subr.mxu0 %v298_v0 }
  0x2f   :  { %181 = vmatpush3.msra.mxu0 %v60_v5 }
  0x30   :  { %182 = vmatprep.subr.mxu0 %v298_v0 }
  0x31   :  { %183 = vmatpush3.msra.mxu0 %v59_v6 }
  0x32   :  { %184 = vmatprep.subr.mxu0 %v298_v0 }
  0x33   :  { %185 = vmatpush3.msra.mxu0 %v58_v7 }
  0x34   :  { %186 = vmatprep.subr.mxu0 %v298_v0 }
  0x35   :  { %187 = vmatpush3.msra.mxu0 %v57_v8 }
  0x36   :  { %188 = vmatprep.subr.mxu0 %v298_v0 }
  0x37   :  { %189 = vmatpush3.msra.mxu0 %v56_v9 }
  0x38   :  { %190 = vmatprep.subr.mxu0 %v298_v0 }
  0x39   :  { %191 = vmatpush3.msra.mxu0 %v55_v10 }
  0x3a   :  { %192 = vmatprep.subr.mxu0 %v298_v0 }
  0x3b   :  { %193 = vmatpush3.msra.mxu0 %v54_v11 }
  0x3c   :  { %194 = vmatprep.subr.mxu0 %v298_v0 }
  0x3d   :  { %195 = vmatpush3.msra.mxu0 %v53_v12 }
  0x3e   :  { %197 = vmatmul.mubr.msk.f32.vlgmr.msra.gmra.mxu0 %vm65_vm1, %v52_v13 }
  0xfe   :  { %v135_v15 = vpop.f32.mrf.mxu0 }
  0xff   :  { %v140_v16 = vsub.f32 %v135_v15, %v139_v14 }
 0x100   :  { %v198_v17 = vpop.f32.mrf.mxu0 }
 0x101   :  { %141 = vst [vmem:[#allocation8] sm:$0xff] %v140_v16 }
 0x102   :  { %278 = shalt.err (!%p275_p5)
}
 0x103   :  { %151 = dma.vmem_to_hbm [thread:$0]  %s149_s2, 128, %s336_s3, [#allocation4]  }
 0x104   :  { %291 = dma.done.wait [#allocation4], 128  }
 0x105   :  { %292 = vsyncadd [#allocation4], 4294967168 }
 0x106   :  { %155 = vsyncpa [#allocation3], 1 }
 0x107   :  { %156 = vsyncpa [#allocation6], 1 }
 0x108   :  { %157 = vsyncpa [#allocation4], 1 }

</bundles_post_ra>
